<compile_context>
chip_gen: v7x
topology: tpu7x:2x2x1
jax: 0.10.0
libtpu: 0.0.40
codegen_flags: <defaults>
</compile_context>

<pallas_src>
import jax
import jax.numpy as jnp
from jax import lax
from jax.experimental import pallas as pl
from jax.experimental.pallas import tpu as pltpu

# Config from the PyTorch test file.
CONFIG = {"seq_length": 8, "head_size": 4, "hidden_size": 4 * 4,
          "n_head": 4, "batch_size": 4}

_INV_SQRT2 = 0.7071067811865475      # 1/sqrt(2) for exact (erf) GELU
_SUBLANE = 8
_LANE = 128
_TARGET_STREAM_BYTES = 1 << 20       # ~1 MiB of activations per grid step


def _round_up(x, m):
    return ((x + m - 1) // m) * m


def _vmem_capacity_bytes():
    try:
        return int(pltpu.get_tpu_info().vmem_capacity_bytes)
    except Exception:                 # conservative fallback (v7x per-TC VMEM)
        return 64 << 20


def _plan_tiles(T, H, F, itemsize, budget):
    """Pick (token_tile, f_tile, weights_resident) against a VMEM byte budget."""
    tokens_for_bytes = _TARGET_STREAM_BYTES // max(1, 2 * H * itemsize)
    tm = int(min(8192, max(512, tokens_for_bytes)))
    tm = min(tm, _round_up(T, _SUBLANE))
    tm = max(_SUBLANE, _round_up(tm, _SUBLANE))

    def need(tm_, tf_, wbufs):
        wts = wbufs * (H * tf_ + tf_ + tf_ * H) * itemsize   # W1, b1_eff, W2
        act = 2 * 2 * tm_ * H * itemsize                     # x + out, 2-deep
        acc = tm_ * H * 4                                    # f32 accumulator
        return wts + act + acc

    tf = F
    resident = need(tm, F, 1) <= budget
    if not resident:
        # First try to stay weights-resident by shrinking the token tile.
        tm_try = tm
        while tm_try // 2 >= 256 and need(tm_try, F, 1) > budget:
            tm_try //= 2
        if need(tm_try, F, 1) <= budget:
            tm, resident = tm_try, True
        else:
            # Stream the weights: tile F (stays a power-of-two divisor of F,
            # floor 128 lanes) and, if still over budget, shrink the token tile.
            while need(tm, tf, 2) > budget and tf % 2 == 0 and tf // 2 >= _LANE:
                tf //= 2
            while need(tm, tf, 2) > budget and tm // 2 >= _SUBLANE:
                tm //= 2
    return tm, tf, resident


def _dmlp_kernel(x_ref, w1_ref, b1_ref, w2_ref, o_ref, acc_ref):
    # x_ref : (tm, H)   activation tile (buf already folded into b1_eff)
    # w1_ref: (H, tf)   fc1 weight slice, (in, out) layout -> plain x @ W
    # b1_ref: (1, tf)   effective fc1 bias slice (= buf @ W1 + b1)
    # w2_ref: (tf, H)   fc2 weight slice, (in, out) layout (fc2 has no bias)
    # o_ref : (tm, H)   output tile
    # acc_ref: (tm, H)  f32 fc2 accumulator, carried across the F axis
    f = pl.program_id(1)

    @pl.when(f == 0)
    def _init():
        acc_ref[...] = jnp.zeros_like(acc_ref)

    h = jnp.dot(x_ref[...], w1_ref[...],
                preferred_element_type=jnp.float32) + b1_ref[...]
    # Exact GELU (erf form), evaluated in f32 — matches torch.nn.GELU() default.
    h = 0.5 * h * (1.0 + lax.erf(h * _INV_SQRT2))
    acc_ref[...] += jnp.dot(h.astype(w2_ref.dtype), w2_ref[...],
                            preferred_element_type=jnp.float32)

    @pl.when(f == pl.num_programs(1) - 1)
    def _finalize():
        o_ref[...] = acc_ref[...].astype(o_ref.dtype)


def prepare_params(w1, b1, w2, buf):
    """One-time parameter prep: fold the ones-buffer add into fc1's bias."""
    b1_eff = (buf @ w1 + b1).reshape(1, -1)
    return w1, b1_eff, w2


@jax.jit
def dmlp_forward(x, w1, b1_eff, w2):
    """x: (B, S, H).  Returns (B, S, H) with DMLP.forward semantics."""
    B, S, H = x.shape
    F = w1.shape[1]
    T = B * S
    itemsize = jnp.dtype(w1.dtype).itemsize

    cap = _vmem_capacity_bytes()
    budget = int(cap * 0.60)          # planning budget (headroom for Mosaic)
    vmem_limit = int(cap * 0.85)      # ~54 MiB on v7x, ~108 MiB on v5e/v6e

    tm, tf, resident = _plan_tiles(T, H, F, itemsize, budget)
    grid_m = pl.cdiv(T, tm)
    grid_f = F // tf
    T_pad = grid_m * tm

    x2 = x.reshape(T, H)
    if T_pad != T:                    # ragged token count: pad, slice back later
        x2 = jnp.pad(x2, ((0, T_pad - T), (0, 0)))

    # Weight specs: streamed F tiles by default; single-buffered resident
    # blocks when the whole F axis fits (constant index_map never re-fetches).
    w1_spec = pl.BlockSpec((H, tf), lambda i, f: (0, f))
    b1_spec = pl.BlockSpec((1, tf), lambda i, f: (0, f))
    w2_spec = pl.BlockSpec((tf, H), lambda i, f: (f, 0))
    if resident:
        try:
            w1_spec = pl.BlockSpec((H, F), lambda i, f: (0, 0),
                                   pipeline_mode=pl.Buffered(1))
            b1_spec = pl.BlockSpec((1, F), lambda i, f: (0, 0),
                                   pipeline_mode=pl.Buffered(1))
            w2_spec = pl.BlockSpec((F, H), lambda i, f: (0, 0),
                                   pipeline_mode=pl.Buffered(1))
        except TypeError:             # older Pallas without pipeline_mode kwarg
            w1_spec = pl.BlockSpec((H, F), lambda i, f: (0, 0))
            b1_spec = pl.BlockSpec((1, F), lambda i, f: (0, 0))
            w2_spec = pl.BlockSpec((F, H), lambda i, f: (0, 0))

    cost = pl.CostEstimate(
        flops=4 * T * H * F,                           # fc1 + fc2 matmuls
        transcendentals=T * F,                         # erf per hidden element
        bytes_accessed=(2 * T * H + 2 * H * F + F) * itemsize,
    )

    out = pl.pallas_call(
        _dmlp_kernel,
        out_shape=jax.ShapeDtypeStruct((T_pad, H), x.dtype),
        grid=(grid_m, grid_f),
        in_specs=[
            pl.BlockSpec((tm, H), lambda i, f: (i, 0)),   # activations (tiled)
            w1_spec, b1_spec, w2_spec,
        ],
        out_specs=pl.BlockSpec((tm, H), lambda i, f: (i, 0)),
        scratch_shapes=[pltpu.VMEM((tm, H), jnp.float32)],
        compiler_params=pltpu.CompilerParams(
            dimension_semantics=("parallel", "arbitrary"),
            vmem_limit_bytes=vmem_limit),
        cost_estimate=cost,
    )(x2, w1, b1_eff, w2)

    if T_pad != T:
        out = out[:T]
    return out.reshape(B, S, H)


def reference_forward(x, buf, w1, b1, w2):
    """Pure-JAX reference with the original (unfused) PyTorch semantics."""
    h = x + buf
    h = jnp.einsum("bsh,hf->bsf", h, w1) + b1
    h = 0.5 * h * (1.0 + lax.erf(h * _INV_SQRT2))
    return jnp.einsum("bsf,fh->bsh", h, w2)


if __name__ == "__main__":
    H = CONFIG["hidden_size"]          # 16
    F = 4 * H                          # 64 (unsharded fc1-out / fc2-in)
    B = CONFIG["batch_size"]           # 4
    S = CONFIG["seq_length"]           # 8

    key = jax.random.PRNGKey(0)
    kx, kw1, kb1, kw2 = jax.random.split(key, 4)

    # Deterministic inputs/params (nn.Linear weights stored transposed as
    # (in, out) for the kernel); buf is the registered ones-buffer.
    x = jax.random.normal(kx, (B, S, H), dtype=jnp.float32)
    buf = jnp.ones((H,), dtype=jnp.float32)
    w1 = jax.random.normal(kw1, (H, F), dtype=jnp.float32) * 0.05
    b1 = jax.random.normal(kb1, (F,), dtype=jnp.float32) * 0.05
    w2 = jax.random.normal(kw2, (F, H), dtype=jnp.float32) * 0.05

    # One-time parameter prep (buf fold) hoisted out of the per-call path.
    w1p, b1_eff, w2p = prepare_params(w1, b1, w2, buf)

    out = jax.block_until_ready(dmlp_forward(x, w1p, b1_eff, w2p))

    ref = reference_forward(x, buf, w1, b1, w2)
    assert out.shape == (B, S, H)
    assert jnp.allclose(out, ref, atol=1e-4, rtol=1e-4), "mismatch vs reference"

    print("KERNEL_OK")
</pallas_src>

<mosaic_0001>
module attributes {stable_mosaic.version = 11 : i64} {
  func.func @_dmlp_kernel(%arg0: i32, %arg1: i32, %arg2: memref<32x16xf32, #tpu.memory_space<vmem>>, %arg3: memref<16x64xf32, #tpu.memory_space<vmem>>, %arg4: memref<1x64xf32, #tpu.memory_space<vmem>>, %arg5: memref<64x16xf32, #tpu.memory_space<vmem>>, %arg6: memref<32x16xf32, #tpu.memory_space<vmem>>, %arg7: memref<32x16xf32, #tpu.memory_space<vmem>>) attributes {dimension_semantics = [#tpu.dimension_semantics<parallel>, #tpu.dimension_semantics<arbitrary>], iteration_bounds = array<i64: 1, 1>, scalar_prefetch = 0 : i64, scratch_operands = 1 : i64, tpu.core_type = #tpu.core_type<tc>, window_params = [{transform_indices = @transform_0, window_bounds = array<i64: 32, 16>}, {pipeline_mode = #tpu.pipeline_mode<synchronous>, transform_indices = @transform_1, window_bounds = array<i64: 16, 64>}, {pipeline_mode = #tpu.pipeline_mode<synchronous>, transform_indices = @transform_2, window_bounds = array<i64: 1, 64>}, {pipeline_mode = #tpu.pipeline_mode<synchronous>, transform_indices = @transform_3, window_bounds = array<i64: 64, 16>}, {transform_indices = @transform_4, window_bounds = array<i64: 32, 16>}]} {
    %c0_i32 = arith.constant 0 : i32
    %0 = arith.cmpi eq, %arg1, %c0_i32 : i32
    %1 = arith.extui %0 : i1 to i32
    %c0_i32_0 = arith.constant 0 : i32
    %2 = arith.cmpi ne, %1, %c0_i32_0 : i32
    scf.if %2 {
      %cst_18 = arith.constant 0.000000e+00 : f32
      %25 = vector.broadcast %cst_18 : f32 to vector<32x16xf32>
      %c0_19 = arith.constant 0 : index
      %c0_20 = arith.constant 0 : index
      %26 = vector.load %arg7[%c0_19, %c0_20] : memref<32x16xf32, #tpu.memory_space<vmem>>, vector<32x16xf32>
      tpu.vector_store %arg7[%c0_19, %c0_20], %25 {strides = array<i32>} : memref<32x16xf32, #tpu.memory_space<vmem>>, vector<32x16xf32>,
    } else {
    }
    %c0 = arith.constant 0 : index
    %c0_1 = arith.constant 0 : index
    %3 = vector.load %arg2[%c0, %c0_1] : memref<32x16xf32, #tpu.memory_space<vmem>>, vector<32x16xf32>
    %c0_2 = arith.constant 0 : index
    %c0_3 = arith.constant 0 : index
    %4 = vector.load %arg3[%c0_2, %c0_3] : memref<16x64xf32, #tpu.memory_space<vmem>>, vector<16x64xf32>
    %cst = arith.constant dense<0.000000e+00> : vector<32x64xf32>
    %5 = tpu.matmul %3, %4, %cst {dimension_numbers = #tpu.dot_dimension_numbers<[1], [0], [0], [1], [0, 0, 1, 1], [], []>} : vector<32x16xf32>, vector<16x64xf32>, vector<32x64xf32> -> vector<32x64xf32>
    %c0_4 = arith.constant 0 : index
    %c0_5 = arith.constant 0 : index
    %6 = vector.load %arg4[%c0_4, %c0_5] : memref<1x64xf32, #tpu.memory_space<vmem>>, vector<1x64xf32>
    %7 = vector.broadcast %6 : vector<1x64xf32> to vector<32x64xf32>
    %8 = arith.addf %5, %7 : vector<32x64xf32>
    %cst_6 = arith.constant 5.000000e-01 : f32
    %9 = vector.broadcast %cst_6 : f32 to vector<32x64xf32>
    %10 = arith.mulf %9, %8 : vector<32x64xf32>
    %cst_7 = arith.constant 0.707106769 : f32
    %11 = vector.broadcast %cst_7 : f32 to vector<32x64xf32>
    %12 = arith.mulf %8, %11 : vector<32x64xf32>
    %13 = math.erf %12 : vector<32x64xf32>
    %cst_8 = arith.constant 1.000000e+00 : f32
    %14 = vector.broadcast %cst_8 : f32 to vector<32x64xf32>
    %15 = arith.addf %14, %13 : vector<32x64xf32>
    %16 = arith.mulf %10, %15 : vector<32x64xf32>
    %c0_9 = arith.constant 0 : index
    %c0_10 = arith.constant 0 : index
    %17 = vector.load %arg7[%c0_9, %c0_10] : memref<32x16xf32, #tpu.memory_space<vmem>>, vector<32x16xf32>
    %c0_11 = arith.constant 0 : index
    %c0_12 = arith.constant 0 : index
    %18 = vector.load %arg5[%c0_11, %c0_12] : memref<64x16xf32, #tpu.memory_space<vmem>>, vector<64x16xf32>
    %cst_13 = arith.constant dense<0.000000e+00> : vector<32x16xf32>
    %19 = tpu.matmul %16, %18, %cst_13 {dimension_numbers = #tpu.dot_dimension_numbers<[1], [0], [0], [1], [0, 0, 1, 1], [], []>} : vector<32x64xf32>, vector<64x16xf32>, vector<32x16xf32> -> vector<32x16xf32>
    %20 = arith.addf %17, %19 : vector<32x16xf32>
    %c0_14 = arith.constant 0 : index
    %c0_15 = arith.constant 0 : index
    %21 = vector.load %arg7[%c0_14, %c0_15] : memref<32x16xf32, #tpu.memory_space<vmem>>, vector<32x16xf32>
    tpu.vector_store %arg7[%c0_14, %c0_15], %20 {strides = array<i32>} : memref<32x16xf32, #tpu.memory_space<vmem>>, vector<32x16xf32>,
    %c0_i32_16 = arith.constant 0 : i32
    %22 = arith.cmpi eq, %arg1, %c0_i32_16 : i32
    %23 = arith.extui %22 : i1 to i32
    %c0_i32_17 = arith.constant 0 : i32
    %24 = arith.cmpi ne, %23, %c0_i32_17 : i32
    scf.if %24 {
      %c0_18 = arith.constant 0 : index
      %c0_19 = arith.constant 0 : index
      %25 = vector.load %arg7[%c0_18, %c0_19] : memref<32x16xf32, #tpu.memory_space<vmem>>, vector<32x16xf32>
      %c0_20 = arith.constant 0 : index
      %c0_21 = arith.constant 0 : index
      %26 = vector.load %arg6[%c0_20, %c0_21] : memref<32x16xf32, #tpu.memory_space<vmem>>, vector<32x16xf32>
      tpu.vector_store %arg6[%c0_20, %c0_21], %25 {strides = array<i32>} : memref<32x16xf32, #tpu.memory_space<vmem>>, vector<32x16xf32>,
    } else {
    }
    return
  }
  func.func @transform_0(%arg0: i32, %arg1: i32) -> (i32, i32) {
    %c0_i32 = arith.constant 0 : i32
    %c0_i32_0 = arith.constant 0 : i32
    return %arg0, %c0_i32 : i32, i32
  }
  func.func @transform_1(%arg0: i32, %arg1: i32) -> (i32, i32) {
    %c0_i32 = arith.constant 0 : i32
    %c0_i32_0 = arith.constant 0 : i32
    %c0_i32_1 = arith.constant 0 : i32
    return %c0_i32, %c0_i32_0 : i32, i32
  }
  func.func @transform_2(%arg0: i32, %arg1: i32) -> (i32, i32) {
    %c0_i32 = arith.constant 0 : i32
    %c0_i32_0 = arith.constant 0 : i32
    %c0_i32_1 = arith.constant 0 : i32
    return %c0_i32, %c0_i32_0 : i32, i32
  }
  func.func @transform_3(%arg0: i32, %arg1: i32) -> (i32, i32) {
    %c0_i32 = arith.constant 0 : i32
    %c0_i32_0 = arith.constant 0 : i32
    %c0_i32_1 = arith.constant 0 : i32
    return %c0_i32, %c0_i32_0 : i32, i32
  }
  func.func @transform_4(%arg0: i32, %arg1: i32) -> (i32, i32) {
    %c0_i32 = arith.constant 0 : i32
    %c0_i32_0 = arith.constant 0 : i32
    return %arg0, %c0_i32 : i32, i32
  }
}

</mosaic_0001>

<bundles_post_ra>
// kernel: dmlp_forward.1
= control target key start
LH: loop header
LB: loop body
LE: loop exit
PB: predicated region body
PF: predicated region fallthrough
CT: control target
= control target key end

     0   :  { %vm22_vm0 = vcmask 130048   ;;  %s520_s0 = inlined_call_operand.vmem [shape: f32[32,16], index: 0, kind: input, shape index: {}]   ;;  %s521_s1 = inlined_call_operand.vmem [shape: f32[16,64], index: 1, kind: input, shape index: {}]   ;;  %s522_s2 = inlined_call_operand.vmem [shape: f32[1,64], index: 2, kind: input, shape index: {}]   ;;  %s523_s3 = inlined_call_operand.vmem [shape: f32[64,16], index: 3, kind: input, shape index: {}]   ;;  %s524_s4 = inlined_call_operand.hbm [shape: f32[32,16], index: 4, kind: output, shape index: {}]  }
   0x1   :  { %v31_v0 = vld [vmem:[%s521_s1] sm:$0xff]  ;;  %v32_v1 = vld [vmem:[%s521_s1 + $0x8] sm:$0xff] }
   0x2   :  { %v27_v2 = vld [vmem:[%s520_s0] sm:$0xff]  ;;  %v362_v3 = vpack.c.bf16 %v32_v1, %v31_v0 }
   0x3   :  { %334 = vmatprep.mubr.msk.f32.mxu0 %vm22_vm0, %v27_v2 }
   0x4   :  { %9 = vsyncpa [#allocation4], 0  ;;  %363 = vmatprep.subr.bf16.mxu0 %v362_v3  ;;  %v28_v4 = vld [vmem:[%s520_s0 + $0x8] sm:$0xff]  ;;  %v29_v5 = vld [vmem:[%s520_s0 + $0x10] sm:$0xff]  ;;  %v418_v19 = vmov 0.0   ;;  %vm170_vm1 = vcmask 523264  }
   0x5   :  { %365 = vmatpush3.bf16.msra.mxu0 %v362_v3  ;;  %v30_v6 = vld [vmem:[%s520_s0 + $0x18] sm:$0xff]  ;;  %v162_v7 = vld [vmem:[%s523_s3] sm:$0xff]  ;;  %v163_v8 = vld [vmem:[%s523_s3 + $0x8] sm:$0xff]  ;;  %24 = vst.msk [vmem:[#allocation2 + $0x8] sm:$0xff] %vm22_vm0, %v418_v19 }
   0x6   :  { %v366_v9 = vpack.c.bf16 %v163_v8, %v162_v7  ;;  %v164_v10 = vld [vmem:[%s523_s3 + $0x10] sm:$0xff]  ;;  %v165_v11 = vld [vmem:[%s523_s3 + $0x18] sm:$0xff]  ;;  %v166_v13 = vld [vmem:[%s523_s3 + $0x20] sm:$0xff]  ;;  %23 = vst.msk [vmem:[#allocation2] sm:$0xff] %vm22_vm0, %v418_v19 }
   0x7   :  { %v370_v12 = vpack.c.bf16 %v165_v11, %v164_v10  ;;  %v167_v14 = vld [vmem:[%s523_s3 + $0x28] sm:$0xff]  ;;  %v168_v16 = vld [vmem:[%s523_s3 + $0x30] sm:$0xff]  ;;  %v169_v17 = vld [vmem:[%s523_s3 + $0x38] sm:$0xff]  ;;  %25 = vst.msk [vmem:[#allocation2 + $0x10] sm:$0xff] %vm22_vm0, %v418_v19 }
   0x8   :  { %335 = vmatmul.mubr.msk.f32.vlgmr.msra.gmra.mrb[0].mxu0 %vm22_vm0, %v28_v4  ;;  %367 = vmatprep.subr.bf16.mxu1 %v366_v9  ;;  %v374_v15 = vpack.c.bf16 %v167_v14, %v166_v13  ;;  %v378_v18 = vpack.c.bf16 %v169_v17, %v168_v16  ;;  %26 = vst.msk [vmem:[#allocation2 + $0x18] sm:$0xff] %vm22_vm0, %v418_v19  ;;  %v303_v20 = vld [vmem:[%s522_s2] ss:$0 sm:$0xff]  ;;  %s419_s2 = smov [#allocation3]  }
   0x9   :  { %337 = vmatprep.mubr.msk.f32.mxu0 %vm22_vm0, %v29_v5  ;;  %369 = vmatpush3.bf16.msra.mxu1 %v366_v9  ;;  %s292_s3 = sshll.u32 %s419_s2, 4  ;;  %s293_s3 = int_to_ptr.vmem [resolvable:$true] %s292_s3 }
   0xa   :  { %371 = vmatprep.subr.bf16.mxu1 %v370_v12  ;;  %s394_s17 = scalar_lea.vmem %s293_s3, 512  ;;  %p399_p1 = scmp.lt.s32.totalorder %s293_s3, %s293_s3 }
   0xb   :  { %p395_p0 = scmp.ne.s32.totalorder %s293_s3, %s394_s17  ;;  %p400_p2 = scmp.lt.s32.totalorder %s394_s17, %s394_s17 }
   0xc   :  { %338 = vmatmul.mubr.msk.f32.gmra.mrb[2].mxu0 %vm22_vm0, %v30_v6  ;;  %v159_v49 = vld [vmem:[#allocation2 + $0x8] sm:$0xff] }
   0xd   :  { %373 = vmatpush3.bf16.msra.mxu1 %v370_v12  ;;  %v158_v50 = vld [vmem:[#allocation2] sm:$0xff]  ;;  %p401_p3 = por %p400_p2, %p399_p1 }
   0xe   :  { %375 = vmatprep.subr.bf16.mxu1 %v374_v15  ;;  %v160_v56 = vld [vmem:[#allocation2 + $0x10] sm:$0xff] }
   0xf   :  { %v161_v55 = vld [vmem:[#allocation2 + $0x18] sm:$0xff]  ;;  %p402_p4 = pnand %p401_p3, %p395_p0 }
  0x11   :  { %377 = vmatpush3.bf16.msra.mxu1 %v374_v15 }
  0x12   :  { %379 = vmatprep.subr.bf16.mxu1 %v378_v18 }
  0x15   :  { %381 = vmatpush3.bf16.msra.mxu1 %v378_v18 }
  0xdb   :  { %v336_v21 = vpop.f32.mrb[0].mxu0 }
  0xdc   :  { %v125_v22 = vadd.f32 %v336_v21, %v303_v20  ;;  %v119_v23 = vpop.f32.mrb[1].mxu0 }
  0xdd   :  { %v120_v24 = vadd.f32 %v303_v20, %v119_v23 }
  0xde   :  { %v143_v25 = vmul.f32 0.70710677, %v125_v22  ;;  %v139_v38 = vmul.f32 0.5, %v125_v22 }
  0xdf   :  { %v142_v26 = vmul.f32 0.70710677, %v120_v24  ;;  %v339_v27 = vpop.f32.mrb[2].mxu0  ;;  %v138_v36 = vmul.f32 0.5, %v120_v24 }
  0xe0   :  { %386 = verf.f32 %v143_v25  ;;  %v135_v28 = vadd.f32 %v339_v27, %v303_v20  ;;  %v129_v29 = vpop.f32.mrb[3].mxu0 }
  0xe1   :  { %388 = verf.f32 %v142_v26  ;;  %v130_v30 = vadd.f32 %v303_v20, %v129_v29 }
  0xe2   :  { %v145_v31 = vmul.f32 0.70710677, %v135_v28  ;;  %v141_v46 = vmul.f32 0.5, %v135_v28 }
  0xe3   :  { %v144_v32 = vmul.f32 0.70710677, %v130_v30  ;;  %v140_v44 = vmul.f32 0.5, %v130_v30 }
  0xe4   :  { %390 = verf.f32 %v145_v31 }
  0xe5   :  { %392 = verf.f32 %v144_v32 }
  0xea   :  { %v387_v33 = vpop.eup %386 }
  0xeb   :  { %v389_v34 = vpop.eup %388  ;;  %v151_v35 = vadd.f32 1.0, %v387_v33 }
  0xec   :  { %v150_v37 = vadd.f32 1.0, %v389_v34 }
  0xed   :  { %v155_v42 = vmul.f32 %v151_v35, %v139_v38 }
  0xee   :  { %v391_v39 = vpop.eup %390  ;;  %v154_v40 = vmul.f32 %v150_v37, %v138_v36 }
  0xef   :  { %v393_v41 = vpop.eup %392  ;;  %v153_v43 = vadd.f32 1.0, %v391_v39 }
  0xf0   :  { %v152_v45 = vadd.f32 1.0, %v393_v41  ;;  %356 = vmatprep.mubr.msk.f32.mxu1 %vm170_vm1, %v154_v40 }
  0xf1   :  { %357 = vmatmul.mubr.msk.f32.vlgmr.msra.gmra.mrb[0].mxu1 %vm170_vm1, %v155_v42  ;;  %v157_v48 = vmul.f32 %v153_v43, %v141_v46 }
  0xf2   :  { %v156_v47 = vmul.f32 %v152_v45, %v140_v44 }
  0xf4   :  { %359 = vmatprep.mubr.msk.f32.mxu1 %vm170_vm1, %v156_v47 }
  0xf5   :  { %360 = vmatmul.mubr.msk.f32.gmra.mrb[2].mxu1 %vm170_vm1, %v157_v48 }
 0x1c4   :  { %v358_v51 = vpop.f32.mrb[0].mxu1 }
 0x1c5   :  { %v269_v52 = vadd.f32 %v358_v51, %v159_v49  ;;  %v249_v53 = vpop.f32.mrb[1].mxu1 }
 0x1c6   :  { %v268_v54 = vadd.f32 %v249_v53, %v158_v50 }
 0x1c7   :  { %273 = vst.msk [vmem:[#allocation2 + $0x8] sm:$0xff] %vm22_vm0, %v269_v52 }
 0x1c8   :  { %272 = vst.msk [vmem:[#allocation2] sm:$0xff] %vm22_vm0, %v268_v54  ;;  %v361_v57 = vpop.f32.mrb[2].mxu1 }
 0x1c9   :  { %v271_v58 = vadd.f32 %v361_v57, %v161_v55  ;;  %v259_v59 = vpop.f32.mrb[3].mxu1 }
 0x1ca   :  { %v270_v60 = vadd.f32 %v259_v59, %v160_v56 }
 0x1cb   :  { %275 = vst.msk [vmem:[#allocation2 + $0x18] sm:$0xff] %vm22_vm0, %v271_v58 }
 0x1cc   :  { %274 = vst.msk [vmem:[#allocation2 + $0x10] sm:$0xff] %vm22_vm0, %v270_v60 }
 0x1ce   :  { %v280_v61 = vld [vmem:[#allocation2 + $0x8] sm:$0xff] }
 0x1cf   :  { %v279_v62 = vld [vmem:[#allocation2] sm:$0xff]  ;;  %284 = vst.msk [vmem:[#allocation3 + $0x8] sm:$0xff] %vm22_vm0, %v280_v61 }
 0x1d0   :  { %283 = vst.msk [vmem:[#allocation3] sm:$0xff] %vm22_vm0, %v279_v62 }
 0x1d2   :  { %v282_v63 = vld [vmem:[#allocation2 + $0x18] sm:$0xff] }
 0x1d3   :  { %v281_v0 = vld [vmem:[#allocation2 + $0x10] sm:$0xff]  ;;  %286 = vst.msk [vmem:[#allocation3 + $0x18] sm:$0xff] %vm22_vm0, %v282_v63 }
 0x1d4   :  { %285 = vst.msk [vmem:[#allocation3 + $0x10] sm:$0xff] %vm22_vm0, %v281_v0 }
 0x1d5   :  { %405 = shalt.err (!%p402_p4)
}
 0x1d6   :  { %s406_s20 = scalar_lea.hbm %s524_s4, 512 }
 0x1d7   :  { %p407_p5 = scmp.ne.s32.totalorder %s524_s4, %s406_s20  ;;  %p410_p6 = scmp.lt.u32.totalorder %s406_s20, %s524_s4 }
 0x1d9   :  { %p412_p7 = pnand %p410_p6, %p407_p5 }
 0x1db   :  { %415 = shalt.err (!%p412_p7)
}
 0x1dc   :  { %s420_s1 = smov 128   ;;  %s421_s25 = smov 8  }
 0x1dd   :  { %298 = dma.vmem_to_hbm [thread:$0]  %s293_s3, 512, %s524_s4, [#allocation4], %s420_s1, %s420_s1, %s421_s25  }
 0x1de   :  { %416 = dma.done.wait [#allocation4], 512  }
 0x1df   :  { %417 = vsyncadd [#allocation4], 4294966784 }
 0x1e0   :  { %302 = vsyncpa [#allocation4], 1 }

</bundles_post_ra>
